<compile_context>
chip_gen: v7x
topology: tpu7x:2x2x1
jax: 0.10.0
libtpu: 0.0.40
codegen_flags: <defaults>
</compile_context>

<pallas_src>
import functools

import jax
import jax.numpy as jnp
from jax.experimental import pallas as pl
from jax.experimental.pallas import tpu as pltpu


def _namegen_kernel(x_ref, wih_ref, whh_ref, bias_ref, wout_ref, bout_ref,
                    o_ref, h_scr, *, T, B):
    """Whole forward pass in one invocation.

    x_ref    : (T*B, Lp)     time-major flattened, zero-padded one-hot letters
    wih_ref  : (Lp, 4H)      fused input weights (gate blocks i|f|g|o along lanes)
    whh_ref  : (H, 4H)       fused recurrent weights (gate blocks i|f|g|o along lanes)
    bias_ref : (T*B, 4H)     fused bias (b_ih + b_hh + s @ W_ih_lang^T), tiled over T
    wout_ref : (H, L_out)    output projection, lane-padded with zero columns
    bout_ref : (1, L_out)    output bias, padded lanes hold -1e9
    o_ref    : (T*B, L_out)  time-major log-probabilities (lane-dense)
    h_scr    : (T*B, H)      VMEM scratch collecting h_t for the hoisted output path
    """
    H = whh_ref.shape[0]

    # Hoisted, time-parallel input projection for all gates of all timesteps,
    # with the per-batch/per-gate bias pre-folded in (nothing bias-related stays
    # on the serial chain).
    xg = (jnp.dot(x_ref[...], wih_ref[...], preferred_element_type=jnp.float32)
          + bias_ref[...])                                   # (T*B, 4H)

    whh = whh_ref[...]                                       # (H, 4H)

    # Lane mask: gate block "g" (cell candidate, lanes [2H, 3H)) uses tanh,
    # the i/f/o blocks use sigmoid.  Hoisted out of the recurrence.
    lane = jax.lax.broadcasted_iota(jnp.int32, (B, 4 * H), 1)
    g_mask = (lane >= 2 * H) & (lane < 3 * H)

    h = jnp.zeros((B, H), jnp.float32)
    c = jnp.zeros((B, H), jnp.float32)

    # Statically unrolled recurrence (T is a small compile-time constant).
    # Per step: ONE lane-dense MXU push, one dense sigmoid + tanh pass over 128
    # lanes, a handful of 32-lane VPU ops, one scratch store.
    for t in range(T):
        sl = slice(t * B, (t + 1) * B)                       # time-major rows for step t
        gates = xg[sl] + jnp.dot(h, whh, preferred_element_type=jnp.float32)  # (B, 4H)
        act = jnp.where(g_mask, jnp.tanh(gates), jax.nn.sigmoid(gates))
        i_g = act[:, 0 * H:1 * H]
        f_g = act[:, 1 * H:2 * H]
        g_g = act[:, 2 * H:3 * H]
        o_g = act[:, 3 * H:4 * H]
        c = f_g * c + i_g * g_g
        h = o_g * jnp.tanh(c)
        h_scr[sl, :] = h

    # Hoisted output projection + log-softmax: one batched dot and one reduction
    # pass over (T*B, L_out), one lane-dense store.
    hs = h_scr[...]                                          # (T*B, H)
    logits = (jnp.dot(hs, wout_ref[...], preferred_element_type=jnp.float32)
              + bout_ref[...])                               # (T*B, L_out)
    # Stable log-softmax; padded lanes carry -1e9 so exp() ~ 0 and they never win max.
    m = jnp.max(logits, axis=-1, keepdims=True)
    z = logits - m
    lse = jnp.log(jnp.sum(jnp.exp(z), axis=-1, keepdims=True))
    o_ref[...] = (z - lse).astype(o_ref.dtype)


def name_generator_forward(x, s, params):
    """x: (B, T, letter_size) f32, s: (B, lang_size) f32. Returns (B, T, letter_size) log-probs."""
    B, T, letter_size = x.shape
    H = params["hidden_size"]

    # Padded sizes for clean TPU layouts.
    B_pad = max(8, pl.cdiv(B, 8) * 8)                 # sublane multiple
    Lp = pl.cdiv(letter_size, 8) * 8                  # MXU K alignment for x-projection
    L_out = pl.cdiv(letter_size, 128) * 128           # lane-dense output width
    G = 4 * H                                         # fused gate width (=128 for H=32)

    w_ih = params["w_ih"]                             # (4H, letter_size + lang_size), gates i,f,g,o
    w_hh = params["w_hh"]                             # (4H, H)
    w_ih_letter = w_ih[:, :letter_size]               # (4H, letter_size)
    w_ih_lang = w_ih[:, letter_size:]                 # (4H, lang_size)

    # Fused (all-gate) weights, transposed so gate blocks lie along lanes.
    w_ih_letter_p = jnp.pad(w_ih_letter, ((0, 0), (0, Lp - letter_size)))  # (4H, Lp)
    wih_f = jnp.transpose(w_ih_letter_p)                                   # (Lp, 4H)
    whh_f = jnp.transpose(w_hh)                                            # (H, 4H)

    # Fused per-batch bias: b_ih + b_hh + the time-invariant language contribution.
    bias = s @ w_ih_lang.T + params["b_ih"] + params["b_hh"]               # (B, 4H)
    bias_p = jnp.pad(bias, ((0, B_pad - B), (0, 0)))                       # (B_pad, 4H)
    bias_tm = jnp.tile(bias_p, (T, 1))                                     # (T*B_pad, 4H)

    # Lane-dense output projection: zero weight columns and -1e9 bias on padded lanes.
    wout = jnp.zeros((H, L_out), jnp.float32).at[:, :letter_size].set(params["w_out"].T)
    bout = jnp.full((1, L_out), -1e9, jnp.float32).at[0, :letter_size].set(params["b_out"])

    # Time-major flattened letter inputs (no (x, s) concat ever materialized).
    x_p = jnp.pad(x, ((0, B_pad - B), (0, 0), (0, Lp - letter_size)))      # (B_pad, T, Lp)
    x_tm = jnp.transpose(x_p, (1, 0, 2)).reshape(T * B_pad, Lp)            # (T*B_pad, Lp)

    vmem = pl.BlockSpec(memory_space=pltpu.MemorySpace.VMEM)
    kernel = functools.partial(_namegen_kernel, T=T, B=B_pad)
    out_flat = pl.pallas_call(
        kernel,
        out_shape=jax.ShapeDtypeStruct((T * B_pad, L_out), jnp.float32),
        in_specs=[vmem] * 6,
        out_specs=vmem,
        scratch_shapes=[pltpu.VMEM((T * B_pad, H), jnp.float32)],
    )(x_tm, wih_f, whh_f, bias_tm, wout, bout)

    out = out_flat.reshape(T, B_pad, L_out)
    out = jnp.transpose(out, (1, 0, 2))[:B, :, :letter_size]               # (B, T, letter_size)
    return out


def _reference_forward(x, s, params):
    """Pure-JAX reference of the same forward pass (lax.scan LSTM) for validation."""
    B, T, letter_size = x.shape
    H = params["hidden_size"]
    s_rep = jnp.broadcast_to(s[:, None, :], (B, T, s.shape[1]))
    inp = jnp.concatenate([x, s_rep], axis=-1)                 # (B, T, D_in)
    wih, whh = params["w_ih"], params["w_hh"]
    b = params["b_ih"] + params["b_hh"]

    def cell(carry, x_t):
        h, c = carry
        gates = x_t @ wih.T + h @ whh.T + b
        i = jax.nn.sigmoid(gates[:, 0 * H:1 * H])
        f = jax.nn.sigmoid(gates[:, 1 * H:2 * H])
        g = jnp.tanh(gates[:, 2 * H:3 * H])
        o = jax.nn.sigmoid(gates[:, 3 * H:4 * H])
        c = f * c + i * g
        h = o * jnp.tanh(c)
        return (h, c), h

    h0 = jnp.zeros((B, H), jnp.float32)
    _, hs = jax.lax.scan(cell, (h0, h0), jnp.transpose(inp, (1, 0, 2)))
    hs = jnp.transpose(hs, (1, 0, 2))                          # (B, T, H)
    logits = hs @ params["w_out"].T + params["b_out"]
    return jax.nn.log_softmax(logits, axis=-1)


def make_params(key, input_size, hidden_size, letter_size):
    """Deterministic init, uniform(-1/sqrt(H), 1/sqrt(H)) like PyTorch's nn.LSTM / nn.Linear."""
    ks = jax.random.split(key, 6)
    bound = 1.0 / jnp.sqrt(hidden_size)
    u = lambda k, shape: jax.random.uniform(k, shape, jnp.float32, -bound, bound)
    return {
        "hidden_size": hidden_size,
        "w_ih": u(ks[0], (4 * hidden_size, input_size)),
        "w_hh": u(ks[1], (4 * hidden_size, hidden_size)),
        "b_ih": u(ks[2], (4 * hidden_size,)),
        "b_hh": u(ks[3], (4 * hidden_size,)),
        "w_out": u(ks[4], (letter_size, hidden_size)),
        "b_out": u(ks[5], (letter_size,)),
    }


if __name__ == "__main__":
    # Small shapes consistent with the module: alphabet=27 -> letter_size=28,
    # 4 languages, hidden=32, batch=2, seq=8.
    B, T = 2, 8
    letter_size = 28
    lang_size = 4
    hidden_size = 32
    input_size = letter_size + lang_size

    key = jax.random.PRNGKey(0)
    k_x, k_s, k_p = jax.random.split(key, 3)

    # One-hot letter sequences and one-hot language vectors (like the dataset encodings).
    letter_ids = jax.random.randint(k_x, (B, T), 0, letter_size)
    x = jax.nn.one_hot(letter_ids, letter_size, dtype=jnp.float32)      # (B, T, letter_size)
    lang_ids = jax.random.randint(k_s, (B,), 0, lang_size)
    s = jax.nn.one_hot(lang_ids, lang_size, dtype=jnp.float32)          # (B, lang_size)

    params = make_params(k_p, input_size, hidden_size, letter_size)

    out = name_generator_forward(x, s, params)
    out = jax.block_until_ready(out)

    ref = _reference_forward(x, s, params)
    assert out.shape == (B, T, letter_size)
    assert jnp.allclose(out, ref, atol=2e-5, rtol=1e-5), "Pallas kernel mismatch vs reference"

    print("KERNEL_OK")
</pallas_src>

<mosaic_0001>
module attributes {stable_mosaic.version = 11 : i64} {
  func.func @_namegen_kernel(%arg0: memref<64x32xf32, #tpu.memory_space<vmem>>, %arg1: memref<32x128xf32, #tpu.memory_space<vmem>>, %arg2: memref<32x128xf32, #tpu.memory_space<vmem>>, %arg3: memref<64x128xf32, #tpu.memory_space<vmem>>, %arg4: memref<32x128xf32, #tpu.memory_space<vmem>>, %arg5: memref<1x128xf32, #tpu.memory_space<vmem>>, %arg6: memref<64x128xf32, #tpu.memory_space<vmem>>, %arg7: memref<64x32xf32, #tpu.memory_space<vmem>>) attributes {dimension_semantics = [], scalar_prefetch = 0 : i64, scratch_operands = 1 : i64, tpu.core_type = #tpu.core_type<tc>} {
    %c0 = arith.constant 0 : index
    %c0_0 = arith.constant 0 : index
    %0 = vector.load %arg0[%c0, %c0_0] : memref<64x32xf32, #tpu.memory_space<vmem>>, vector<64x32xf32>
    %c0_1 = arith.constant 0 : index
    %c0_2 = arith.constant 0 : index
    %1 = vector.load %arg1[%c0_1, %c0_2] : memref<32x128xf32, #tpu.memory_space<vmem>>, vector<32x128xf32>
    %cst = arith.constant dense<0.000000e+00> : vector<64x128xf32>
    %2 = tpu.matmul %0, %1, %cst {dimension_numbers = #tpu.dot_dimension_numbers<[1], [0], [0], [1], [0, 0, 1, 1], [], []>} : vector<64x32xf32>, vector<32x128xf32>, vector<64x128xf32> -> vector<64x128xf32>
    %c0_3 = arith.constant 0 : index
    %c0_4 = arith.constant 0 : index
    %3 = vector.load %arg3[%c0_3, %c0_4] : memref<64x128xf32, #tpu.memory_space<vmem>>, vector<64x128xf32>
    %4 = arith.addf %2, %3 : vector<64x128xf32>
    %c0_5 = arith.constant 0 : index
    %c0_6 = arith.constant 0 : index
    %5 = vector.load %arg2[%c0_5, %c0_6] : memref<32x128xf32, #tpu.memory_space<vmem>>, vector<32x128xf32>
    %6 = tpu.iota {dimensions = array<i32: 1>} : vector<8x128xi32>
    %c64_i32 = arith.constant 64 : i32
    %7 = vector.broadcast %c64_i32 : i32 to vector<8x128xi32>
    %8 = arith.cmpi sge, %6, %7 : vector<8x128xi32>
    %c96_i32 = arith.constant 96 : i32
    %9 = vector.broadcast %c96_i32 : i32 to vector<8x128xi32>
    %10 = arith.cmpi slt, %6, %9 : vector<8x128xi32>
    %11 = arith.andi %8, %10 : vector<8x128xi1>
    %cst_7 = arith.constant 0.000000e+00 : f32
    %12 = vector.broadcast %cst_7 : f32 to vector<8x32xf32>
    %cst_8 = arith.constant 0.000000e+00 : f32
    %13 = vector.broadcast %cst_8 : f32 to vector<8x32xf32>
    %14 = vector.extract_strided_slice %4 {offsets = [0, 0], sizes = [8, 128], strides = [1, 1]} : vector<64x128xf32> to vector<8x128xf32>
    %cst_9 = arith.constant dense<0.000000e+00> : vector<8x128xf32>
    %15 = tpu.matmul %12, %5, %cst_9 {dimension_numbers = #tpu.dot_dimension_numbers<[1], [0], [0], [1], [0, 0, 1, 1], [], []>} : vector<8x32xf32>, vector<32x128xf32>, vector<8x128xf32> -> vector<8x128xf32>
    %16 = arith.addf %14, %15 : vector<8x128xf32>
    %17 = math.tanh %16 : vector<8x128xf32>
    %18 = arith.negf %16 : vector<8x128xf32>
    %19 = math.exp %18 : vector<8x128xf32>
    %cst_10 = arith.constant 1.000000e+00 : f32
    %20 = vector.broadcast %cst_10 : f32 to vector<8x128xf32>
    %21 = arith.addf %20, %19 : vector<8x128xf32>
    %22 = arith.divf %20, %21 : vector<8x128xf32>
    %23 = arith.select %11, %17, %22 : vector<8x128xi1>, vector<8x128xf32>
    %24 = vector.extract_strided_slice %23 {offsets = [0, 0], sizes = [8, 32], strides = [1, 1]} : vector<8x128xf32> to vector<8x32xf32>
    %25 = vector.extract_strided_slice %23 {offsets = [0, 32], sizes = [8, 32], strides = [1, 1]} : vector<8x128xf32> to vector<8x32xf32>
    %26 = vector.extract_strided_slice %23 {offsets = [0, 64], sizes = [8, 32], strides = [1, 1]} : vector<8x128xf32> to vector<8x32xf32>
    %27 = vector.extract_strided_slice %23 {offsets = [0, 96], sizes = [8, 32], strides = [1, 1]} : vector<8x128xf32> to vector<8x32xf32>
    %28 = arith.mulf %25, %13 : vector<8x32xf32>
    %29 = arith.mulf %24, %26 : vector<8x32xf32>
    %30 = arith.addf %28, %29 : vector<8x32xf32>
    %31 = math.tanh %30 : vector<8x32xf32>
    %32 = arith.mulf %27, %31 : vector<8x32xf32>
    %c0_11 = arith.constant 0 : index
    %c0_12 = arith.constant 0 : index
    %33 = vector.load %arg7[%c0_11, %c0_12] : memref<64x32xf32, #tpu.memory_space<vmem>>, vector<8x32xf32>
    tpu.vector_store %arg7[%c0_11, %c0_12], %32 {strides = array<i32>} : memref<64x32xf32, #tpu.memory_space<vmem>>, vector<8x32xf32>,
    %34 = vector.extract_strided_slice %4 {offsets = [8, 0], sizes = [8, 128], strides = [1, 1]} : vector<64x128xf32> to vector<8x128xf32>
    %cst_13 = arith.constant dense<0.000000e+00> : vector<8x128xf32>
    %35 = tpu.matmul %32, %5, %cst_13 {dimension_numbers = #tpu.dot_dimension_numbers<[1], [0], [0], [1], [0, 0, 1, 1], [], []>} : vector<8x32xf32>, vector<32x128xf32>, vector<8x128xf32> -> vector<8x128xf32>
    %36 = arith.addf %34, %35 : vector<8x128xf32>
    %37 = math.tanh %36 : vector<8x128xf32>
    %38 = arith.negf %36 : vector<8x128xf32>
    %39 = math.exp %38 : vector<8x128xf32>
    %cst_14 = arith.constant 1.000000e+00 : f32
    %40 = vector.broadcast %cst_14 : f32 to vector<8x128xf32>
    %41 = arith.addf %40, %39 : vector<8x128xf32>
    %42 = arith.divf %40, %41 : vector<8x128xf32>
    %43 = arith.select %11, %37, %42 : vector<8x128xi1>, vector<8x128xf32>
    %44 = vector.extract_strided_slice %43 {offsets = [0, 0], sizes = [8, 32], strides = [1, 1]} : vector<8x128xf32> to vector<8x32xf32>
    %45 = vector.extract_strided_slice %43 {offsets = [0, 32], sizes = [8, 32], strides = [1, 1]} : vector<8x128xf32> to vector<8x32xf32>
    %46 = vector.extract_strided_slice %43 {offsets = [0, 64], sizes = [8, 32], strides = [1, 1]} : vector<8x128xf32> to vector<8x32xf32>
    %47 = vector.extract_strided_slice %43 {offsets = [0, 96], sizes = [8, 32], strides = [1, 1]} : vector<8x128xf32> to vector<8x32xf32>
    %48 = arith.mulf %45, %30 : vector<8x32xf32>
    %49 = arith.mulf %44, %46 : vector<8x32xf32>
    %50 = arith.addf %48, %49 : vector<8x32xf32>
    %51 = math.tanh %50 : vector<8x32xf32>
    %52 = arith.mulf %47, %51 : vector<8x32xf32>
    %c8 = arith.constant 8 : index
    %c0_15 = arith.constant 0 : index
    %53 = vector.load %arg7[%c8, %c0_15] : memref<64x32xf32, #tpu.memory_space<vmem>>, vector<8x32xf32>
    tpu.vector_store %arg7[%c8, %c0_15], %52 {strides = array<i32>} : memref<64x32xf32, #tpu.memory_space<vmem>>, vector<8x32xf32>,
    %54 = vector.extract_strided_slice %4 {offsets = [16, 0], sizes = [8, 128], strides = [1, 1]} : vector<64x128xf32> to vector<8x128xf32>
    %cst_16 = arith.constant dense<0.000000e+00> : vector<8x128xf32>
    %55 = tpu.matmul %52, %5, %cst_16 {dimension_numbers = #tpu.dot_dimension_numbers<[1], [0], [0], [1], [0, 0, 1, 1], [], []>} : vector<8x32xf32>, vector<32x128xf32>, vector<8x128xf32> -> vector<8x128xf32>
    %56 = arith.addf %54, %55 : vector<8x128xf32>
    %57 = math.tanh %56 : vector<8x128xf32>
    %58 = arith.negf %56 : vector<8x128xf32>
    %59 = math.exp %58 : vector<8x128xf32>
    %cst_17 = arith.constant 1.000000e+00 : f32
    %60 = vector.broadcast %cst_17 : f32 to vector<8x128xf32>
    %61 = arith.addf %60, %59 : vector<8x128xf32>
    %62 = arith.divf %60, %61 : vector<8x128xf32>
    %63 = arith.select %11, %57, %62 : vector<8x128xi1>, vector<8x128xf32>
    %64 = vector.extract_strided_slice %63 {offsets = [0, 0], sizes = [8, 32], strides = [1, 1]} : vector<8x128xf32> to vector<8x32xf32>
    %65 = vector.extract_strided_slice %63 {offsets = [0, 32], sizes = [8, 32], strides = [1, 1]} : vector<8x128xf32> to vector<8x32xf32>
    %66 = vector.extract_strided_slice %63 {offsets = [0, 64], sizes = [8, 32], strides = [1, 1]} : vector<8x128xf32> to vector<8x32xf32>
    %67 = vector.extract_strided_slice %63 {offsets = [0, 96], sizes = [8, 32], strides = [1, 1]} : vector<8x128xf32> to vector<8x32xf32>
    %68 = arith.mulf %65, %50 : vector<8x32xf32>
    %69 = arith.mulf %64, %66 : vector<8x32xf32>
    %70 = arith.addf %68, %69 : vector<8x32xf32>
    %71 = math.tanh %70 : vector<8x32xf32>
    %72 = arith.mulf %67, %71 : vector<8x32xf32>
    %c16 = arith.constant 16 : index
    %c0_18 = arith.constant 0 : index
    %73 = vector.load %arg7[%c16, %c0_18] : memref<64x32xf32, #tpu.memory_space<vmem>>, vector<8x32xf32>
    tpu.vector_store %arg7[%c16, %c0_18], %72 {strides = array<i32>} : memref<64x32xf32, #tpu.memory_space<vmem>>, vector<8x32xf32>,
    %74 = vector.extract_strided_slice %4 {offsets = [24, 0], sizes = [8, 128], strides = [1, 1]} : vector<64x128xf32> to vector<8x128xf32>
    %cst_19 = arith.constant dense<0.000000e+00> : vector<8x128xf32>
    %75 = tpu.matmul %72, %5, %cst_19 {dimension_numbers = #tpu.dot_dimension_numbers<[1], [0], [0], [1], [0, 0, 1, 1], [], []>} : vector<8x32xf32>, vector<32x128xf32>, vector<8x128xf32> -> vector<8x128xf32>
    %76 = arith.addf %74, %75 : vector<8x128xf32>
    %77 = math.tanh %76 : vector<8x128xf32>
    %78 = arith.negf %76 : vector<8x128xf32>
    %79 = math.exp %78 : vector<8x128xf32>
    %cst_20 = arith.constant 1.000000e+00 : f32
    %80 = vector.broadcast %cst_20 : f32 to vector<8x128xf32>
    %81 = arith.addf %80, %79 : vector<8x128xf32>
    %82 = arith.divf %80, %81 : vector<8x128xf32>
    %83 = arith.select %11, %77, %82 : vector<8x128xi1>, vector<8x128xf32>
    %84 = vector.extract_strided_slice %83 {offsets = [0, 0], sizes = [8, 32], strides = [1, 1]} : vector<8x128xf32> to vector<8x32xf32>
    %85 = vector.extract_strided_slice %83 {offsets = [0, 32], sizes = [8, 32], strides = [1, 1]} : vector<8x128xf32> to vector<8x32xf32>
    %86 = vector.extract_strided_slice %83 {offsets = [0, 64], sizes = [8, 32], strides = [1, 1]} : vector<8x128xf32> to vector<8x32xf32>
    %87 = vector.extract_strided_slice %83 {offsets = [0, 96], sizes = [8, 32], strides = [1, 1]} : vector<8x128xf32> to vector<8x32xf32>
    %88 = arith.mulf %85, %70 : vector<8x32xf32>
    %89 = arith.mulf %84, %86 : vector<8x32xf32>
    %90 = arith.addf %88, %89 : vector<8x32xf32>
    %91 = math.tanh %90 : vector<8x32xf32>
    %92 = arith.mulf %87, %91 : vector<8x32xf32>
    %c24 = arith.constant 24 : index
    %c0_21 = arith.constant 0 : index
    %93 = vector.load %arg7[%c24, %c0_21] : memref<64x32xf32, #tpu.memory_space<vmem>>, vector<8x32xf32>
    tpu.vector_store %arg7[%c24, %c0_21], %92 {strides = array<i32>} : memref<64x32xf32, #tpu.memory_space<vmem>>, vector<8x32xf32>,
    %94 = vector.extract_strided_slice %4 {offsets = [32, 0], sizes = [8, 128], strides = [1, 1]} : vector<64x128xf32> to vector<8x128xf32>
    %cst_22 = arith.constant dense<0.000000e+00> : vector<8x128xf32>
    %95 = tpu.matmul %92, %5, %cst_22 {dimension_numbers = #tpu.dot_dimension_numbers<[1], [0], [0], [1], [0, 0, 1, 1], [], []>} : vector<8x32xf32>, vector<32x128xf32>, vector<8x128xf32> -> vector<8x128xf32>
    %96 = arith.addf %94, %95 : vector<8x128xf32>
    %97 = math.tanh %96 : vector<8x128xf32>
    %98 = arith.negf %96 : vector<8x128xf32>
    %99 = math.exp %98 : vector<8x128xf32>
    %cst_23 = arith.constant 1.000000e+00 : f32
    %100 = vector.broadcast %cst_23 : f32 to vector<8x128xf32>
    %101 = arith.addf %100, %99 : vector<8x128xf32>
    %102 = arith.divf %100, %101 : vector<8x128xf32>
    %103 = arith.select %11, %97, %102 : vector<8x128xi1>, vector<8x128xf32>
    %104 = vector.extract_strided_slice %103 {offsets = [0, 0], sizes = [8, 32], strides = [1, 1]} : vector<8x128xf32> to vector<8x32xf32>
    %105 = vector.extract_strided_slice %103 {offsets = [0, 32], sizes = [8, 32], strides = [1, 1]} : vector<8x128xf32> to vector<8x32xf32>
    %106 = vector.extract_strided_slice %103 {offsets = [0, 64], sizes = [8, 32], strides = [1, 1]} : vector<8x128xf32> to vector<8x32xf32>
    %107 = vector.extract_strided_slice %103 {offsets = [0, 96], sizes = [8, 32], strides = [1, 1]} : vector<8x128xf32> to vector<8x32xf32>
    %108 = arith.mulf %105, %90 : vector<8x32xf32>
    %109 = arith.mulf %104, %106 : vector<8x32xf32>
    %110 = arith.addf %108, %109 : vector<8x32xf32>
    %111 = math.tanh %110 : vector<8x32xf32>
    %112 = arith.mulf %107, %111 : vector<8x32xf32>
    %c32 = arith.constant 32 : index
    %c0_24 = arith.constant 0 : index
    %113 = vector.load %arg7[%c32, %c0_24] : memref<64x32xf32, #tpu.memory_space<vmem>>, vector<8x32xf32>
    tpu.vector_store %arg7[%c32, %c0_24], %112 {strides = array<i32>} : memref<64x32xf32, #tpu.memory_space<vmem>>, vector<8x32xf32>,
    %114 = vector.extract_strided_slice %4 {offsets = [40, 0], sizes = [8, 128], strides = [1, 1]} : vector<64x128xf32> to vector<8x128xf32>
    %cst_25 = arith.constant dense<0.000000e+00> : vector<8x128xf32>
    %115 = tpu.matmul %112, %5, %cst_25 {dimension_numbers = #tpu.dot_dimension_numbers<[1], [0], [0], [1], [0, 0, 1, 1], [], []>} : vector<8x32xf32>, vector<32x128xf32>, vector<8x128xf32> -> vector<8x128xf32>
    %116 = arith.addf %114, %115 : vector<8x128xf32>
    %117 = math.tanh %116 : vector<8x128xf32>
    %118 = arith.negf %116 : vector<8x128xf32>
    %119 = math.exp %118 : vector<8x128xf32>
    %cst_26 = arith.constant 1.000000e+00 : f32
    %120 = vector.broadcast %cst_26 : f32 to vector<8x128xf32>
    %121 = arith.addf %120, %119 : vector<8x128xf32>
    %122 = arith.divf %120, %121 : vector<8x128xf32>
    %123 = arith.select %11, %117, %122 : vector<8x128xi1>, vector<8x128xf32>
    %124 = vector.extract_strided_slice %123 {offsets = [0, 0], sizes = [8, 32], strides = [1, 1]} : vector<8x128xf32> to vector<8x32xf32>
    %125 = vector.extract_strided_slice %123 {offsets = [0, 32], sizes = [8, 32], strides = [1, 1]} : vector<8x128xf32> to vector<8x32xf32>
    %126 = vector.extract_strided_slice %123 {offsets = [0, 64], sizes = [8, 32], strides = [1, 1]} : vector<8x128xf32> to vector<8x32xf32>
    %127 = vector.extract_strided_slice %123 {offsets = [0, 96], sizes = [8, 32], strides = [1, 1]} : vector<8x128xf32> to vector<8x32xf32>
    %128 = arith.mulf %125, %110 : vector<8x32xf32>
    %129 = arith.mulf %124, %126 : vector<8x32xf32>
    %130 = arith.addf %128, %129 : vector<8x32xf32>
    %131 = math.tanh %130 : vector<8x32xf32>
    %132 = arith.mulf %127, %131 : vector<8x32xf32>
    %c40 = arith.constant 40 : index
    %c0_27 = arith.constant 0 : index
    %133 = vector.load %arg7[%c40, %c0_27] : memref<64x32xf32, #tpu.memory_space<vmem>>, vector<8x32xf32>
    tpu.vector_store %arg7[%c40, %c0_27], %132 {strides = array<i32>} : memref<64x32xf32, #tpu.memory_space<vmem>>, vector<8x32xf32>,
    %134 = vector.extract_strided_slice %4 {offsets = [48, 0], sizes = [8, 128], strides = [1, 1]} : vector<64x128xf32> to vector<8x128xf32>
    %cst_28 = arith.constant dense<0.000000e+00> : vector<8x128xf32>
    %135 = tpu.matmul %132, %5, %cst_28 {dimension_numbers = #tpu.dot_dimension_numbers<[1], [0], [0], [1], [0, 0, 1, 1], [], []>} : vector<8x32xf32>, vector<32x128xf32>, vector<8x128xf32> -> vector<8x128xf32>
    %136 = arith.addf %134, %135 : vector<8x128xf32>
    %137 = math.tanh %136 : vector<8x128xf32>
    %138 = arith.negf %136 : vector<8x128xf32>
    %139 = math.exp %138 : vector<8x128xf32>
    %cst_29 = arith.constant 1.000000e+00 : f32
    %140 = vector.broadcast %cst_29 : f32 to vector<8x128xf32>
    %141 = arith.addf %140, %139 : vector<8x128xf32>
    %142 = arith.divf %140, %141 : vector<8x128xf32>
    %143 = arith.select %11, %137, %142 : vector<8x128xi1>, vector<8x128xf32>
    %144 = vector.extract_strided_slice %143 {offsets = [0, 0], sizes = [8, 32], strides = [1, 1]} : vector<8x128xf32> to vector<8x32xf32>
    %145 = vector.extract_strided_slice %143 {offsets = [0, 32], sizes = [8, 32], strides = [1, 1]} : vector<8x128xf32> to vector<8x32xf32>
    %146 = vector.extract_strided_slice %143 {offsets = [0, 64], sizes = [8, 32], strides = [1, 1]} : vector<8x128xf32> to vector<8x32xf32>
    %147 = vector.extract_strided_slice %143 {offsets = [0, 96], sizes = [8, 32], strides = [1, 1]} : vector<8x128xf32> to vector<8x32xf32>
    %148 = arith.mulf %145, %130 : vector<8x32xf32>
    %149 = arith.mulf %144, %146 : vector<8x32xf32>
    %150 = arith.addf %148, %149 : vector<8x32xf32>
    %151 = math.tanh %150 : vector<8x32xf32>
    %152 = arith.mulf %147, %151 : vector<8x32xf32>
    %c48 = arith.constant 48 : index
    %c0_30 = arith.constant 0 : index
    %153 = vector.load %arg7[%c48, %c0_30] : memref<64x32xf32, #tpu.memory_space<vmem>>, vector<8x32xf32>
    tpu.vector_store %arg7[%c48, %c0_30], %152 {strides = array<i32>} : memref<64x32xf32, #tpu.memory_space<vmem>>, vector<8x32xf32>,
    %154 = vector.extract_strided_slice %4 {offsets = [56, 0], sizes = [8, 128], strides = [1, 1]} : vector<64x128xf32> to vector<8x128xf32>
    %cst_31 = arith.constant dense<0.000000e+00> : vector<8x128xf32>
    %155 = tpu.matmul %152, %5, %cst_31 {dimension_numbers = #tpu.dot_dimension_numbers<[1], [0], [0], [1], [0, 0, 1, 1], [], []>} : vector<8x32xf32>, vector<32x128xf32>, vector<8x128xf32> -> vector<8x128xf32>
    %156 = arith.addf %154, %155 : vector<8x128xf32>
    %157 = math.tanh %156 : vector<8x128xf32>
    %158 = arith.negf %156 : vector<8x128xf32>
    %159 = math.exp %158 : vector<8x128xf32>
    %cst_32 = arith.constant 1.000000e+00 : f32
    %160 = vector.broadcast %cst_32 : f32 to vector<8x128xf32>
    %161 = arith.addf %160, %159 : vector<8x128xf32>
    %162 = arith.divf %160, %161 : vector<8x128xf32>
    %163 = arith.select %11, %157, %162 : vector<8x128xi1>, vector<8x128xf32>
    %164 = vector.extract_strided_slice %163 {offsets = [0, 0], sizes = [8, 32], strides = [1, 1]} : vector<8x128xf32> to vector<8x32xf32>
    %165 = vector.extract_strided_slice %163 {offsets = [0, 32], sizes = [8, 32], strides = [1, 1]} : vector<8x128xf32> to vector<8x32xf32>
    %166 = vector.extract_strided_slice %163 {offsets = [0, 64], sizes = [8, 32], strides = [1, 1]} : vector<8x128xf32> to vector<8x32xf32>
    %167 = vector.extract_strided_slice %163 {offsets = [0, 96], sizes = [8, 32], strides = [1, 1]} : vector<8x128xf32> to vector<8x32xf32>
    %168 = arith.mulf %165, %150 : vector<8x32xf32>
    %169 = arith.mulf %164, %166 : vector<8x32xf32>
    %170 = arith.addf %168, %169 : vector<8x32xf32>
    %171 = math.tanh %170 : vector<8x32xf32>
    %172 = arith.mulf %167, %171 : vector<8x32xf32>
    %c56 = arith.constant 56 : index
    %c0_33 = arith.constant 0 : index
    %173 = vector.load %arg7[%c56, %c0_33] : memref<64x32xf32, #tpu.memory_space<vmem>>, vector<8x32xf32>
    tpu.vector_store %arg7[%c56, %c0_33], %172 {strides = array<i32>} : memref<64x32xf32, #tpu.memory_space<vmem>>, vector<8x32xf32>,
    %c0_34 = arith.constant 0 : index
    %c0_35 = arith.constant 0 : index
    %174 = vector.load %arg7[%c0_34, %c0_35] : memref<64x32xf32, #tpu.memory_space<vmem>>, vector<64x32xf32>
    %c0_36 = arith.constant 0 : index
    %c0_37 = arith.constant 0 : index
    %175 = vector.load %arg4[%c0_36, %c0_37] : memref<32x128xf32, #tpu.memory_space<vmem>>, vector<32x128xf32>
    %cst_38 = arith.constant dense<0.000000e+00> : vector<64x128xf32>
    %176 = tpu.matmul %174, %175, %cst_38 {dimension_numbers = #tpu.dot_dimension_numbers<[1], [0], [0], [1], [0, 0, 1, 1], [], []>} : vector<64x32xf32>, vector<32x128xf32>, vector<64x128xf32> -> vector<64x128xf32>
    %c0_39 = arith.constant 0 : index
    %c0_40 = arith.constant 0 : index
    %177 = vector.load %arg5[%c0_39, %c0_40] : memref<1x128xf32, #tpu.memory_space<vmem>>, vector<1x128xf32>
    %178 = vector.broadcast %177 : vector<1x128xf32> to vector<64x128xf32>
    %179 = arith.addf %176, %178 : vector<64x128xf32>
    %cst_41 = arith.constant dense<0xFF800000> : vector<64xf32>
    %180 = vector.multi_reduction <maximumf>, %179, %cst_41 [1] : vector<64x128xf32> to vector<64xf32>
    %181 = vector.shape_cast %180 : vector<64xf32> to vector<64x1xf32>
    %182 = vector.broadcast %181 : vector<64x1xf32> to vector<64x128xf32>
    %183 = arith.subf %179, %182 : vector<64x128xf32>
    %184 = math.exp %183 : vector<64x128xf32>
    %cst_42 = arith.constant dense<0.000000e+00> : vector<64xf32>
    %185 = vector.multi_reduction <add>, %184, %cst_42 [1] : vector<64x128xf32> to vector<64xf32>
    %186 = vector.shape_cast %185 : vector<64xf32> to vector<64x1xf32>
    %187 = math.log %186 : vector<64x1xf32>
    %188 = vector.broadcast %187 : vector<64x1xf32> to vector<64x128xf32>
    %189 = arith.subf %183, %188 : vector<64x128xf32>
    %c0_43 = arith.constant 0 : index
    %c0_44 = arith.constant 0 : index
    %190 = vector.load %arg6[%c0_43, %c0_44] : memref<64x128xf32, #tpu.memory_space<vmem>>, vector<64x128xf32>
    tpu.vector_store %arg6[%c0_43, %c0_44], %189 {strides = array<i32>} : memref<64x128xf32, #tpu.memory_space<vmem>>, vector<64x128xf32>,
    return
  }
}

</mosaic_0001>

<bundles_post_ra>
// kernel: tpu_custom_call.1
= control target key start
LH: loop header
LB: loop body
LE: loop exit
PB: predicated region body
PF: predicated region fallthrough
CT: control target
= control target key end

     0   :  { %11 = vsyncpa [#allocation4], 0  ;;  %s2088_s0 = inlined_call_operand.vmem [shape: f32[64,32], index: 0, kind: input, shape index: {}]   ;;  %s2089_s1 = inlined_call_operand.vmem [shape: f32[32,128], index: 1, kind: input, shape index: {}]   ;;  %s2090_s2 = inlined_call_operand.hbm [shape: f32[32,128], index: 2, kind: input, shape index: {}]   ;;  %s2091_s3 = inlined_call_operand.vmem [shape: f32[64,128], index: 3, kind: input, shape index: {}]   ;;  %s2092_s4 = inlined_call_operand.hbm [shape: f32[32,128], index: 4, kind: input, shape index: {}]   ;;  %s2093_s5 = inlined_call_operand.vmem [shape: f32[1,128], index: 5, kind: input, shape index: {}]   ;;  %s2094_s6 = inlined_call_operand.hbm [shape: f32[64,128], index: 6, kind: output, shape index: {}]  }
   0x1   :  { %12 = vsyncpa [#allocation7], 0 }
   0x2   :  { %13 = vsyncpa [#allocation5], 0  ;;  %s1760_s21 = smov [#allocation3]   ;;  %s1688_s25 = scalar_lea.hbm %s2090_s2, 512 }
   0x3   :  { %s23_s22 = sshll.u32 %s1760_s21, 4  ;;  %p1689_p0 = scmp.ne.s32.totalorder %s2090_s2, %s1688_s25  ;;  %s24_s22 = int_to_ptr.vmem [resolvable:$true] %s23_s22 }
   0x4   :  { %p1692_p1 = scmp.lt.u32.totalorder %s1688_s25, %s2090_s2 }
   0x6   :  { %p1694_p2 = pnand %p1692_p1, %p1689_p0 }
   0x8   :  { %1697 = shalt.err (!%p1694_p2)
}
   0x9   :  { %s1698_s30 = scalar_lea.vmem %s24_s22, 512  ;;  %p1703_p4 = scmp.lt.s32.totalorder %s24_s22, %s24_s22 }
   0xa   :  { %p1699_p3 = scmp.ne.s32.totalorder %s24_s22, %s1698_s30  ;;  %p1704_p5 = scmp.lt.s32.totalorder %s1698_s30, %s1698_s30 }
   0xc   :  { %p1705_p6 = por %p1704_p5, %p1703_p4 }
   0xe   :  { %p1706_p7 = pnand %p1705_p6, %p1699_p3 }
  0x10   :  { %1709 = shalt.err (!%p1706_p7)
}
  0x11   :  { %s1761_s7 = smov 128   ;;  %s1762_s8 = smov 8  }
  0x12   :  { %29 = dma.hbm_to_vmem [thread:$0]  %s2090_s2, 512, %s24_s22, [#allocation4], %s1761_s7, %s1761_s7, %s1762_s8  }
  0x13   :  { %s1763_s11 = smov [#allocation6]   ;;  %s1710_s15 = scalar_lea.hbm %s2092_s4, 512 }
  0x14   :  { %s37_s12 = sshll.u32 %s1763_s11, 4  ;;  %p1711_p8 = scmp.ne.s32.totalorder %s2092_s4, %s1710_s15  ;;  %s38_s12 = int_to_ptr.vmem [resolvable:$true] %s37_s12 }
  0x15   :  { %p1714_p9 = scmp.lt.u32.totalorder %s1710_s15, %s2092_s4 }
  0x17   :  { %p1716_p10 = pnand %p1714_p9, %p1711_p8 }
  0x19   :  { %1719 = shalt.err (!%p1716_p10)
}
  0x1a   :  { %s1720_s20 = scalar_lea.vmem %s38_s12, 512  ;;  %p1725_p12 = scmp.lt.s32.totalorder %s38_s12, %s38_s12 }
  0x1b   :  { %p1721_p11 = scmp.ne.s32.totalorder %s38_s12, %s1720_s20  ;;  %p1726_p13 = scmp.lt.s32.totalorder %s1720_s20, %s1720_s20 }
  0x1d   :  { %p1727_p0 = por %p1726_p13, %p1725_p12 }
  0x1f   :  { %p1728_p1 = pnand %p1727_p0, %p1721_p11 }
  0x21   :  { %1731 = shalt.err (!%p1728_p1)
}
  0x22   :  { %43 = dma.hbm_to_vmem [thread:$0]  %s2092_s4, 512, %s38_s12, [#allocation7], %s1761_s7, %s1761_s7, %s1762_s8  }
  0x23   :  { %1754 = dma.done.wait [#allocation4], 512  }
  0x24   :  { %1755 = vsyncadd [#allocation4], 4294966784 }
  0x25   :  { %1756 = dma.done.wait [#allocation7], 512  }
  0x26   :  { %1757 = vsyncadd [#allocation7], 4294966784  ;;  %vm72_vm0 = vcmask 261120   ;;  %v60_v0 = vld [vmem:[%s2089_s1] sm:$0xff]  ;;  %v61_v1 = vld [vmem:[%s2089_s1 + $0x8] sm:$0xff]  ;;  %v1764_v13 = vmov 0.0|0.0   ;;  %v206_v33 = vlaneseq }
  0x27   :  { %v62_v2 = vld [vmem:[%s2089_s1 + $0x10] sm:$0xff]  ;;  %v1514_v3 = vpack.c.bf16 %v61_v1, %v60_v0  ;;  %v63_v4 = vld [vmem:[%s2089_s1 + $0x18] sm:$0xff]  ;;  %v56_v5 = vld [vmem:[%s2088_s0 + $0x20] sm:$0xff]  ;;  %vm1765_vm1 = vmmov 0   ;;  %v1766_v19 = vmov 0.0   ;;  %s1767_s20 = smov 64  }
  0x28   :  { %v1518_v6 = vpack.c.bf16 %v63_v4, %v62_v2  ;;  %1400 = vmatprep.mubr.msk.f32.mxu1 %vm72_vm0, %v56_v5  ;;  %v52_v7 = vld [vmem:[%s2088_s0] sm:$0xff]  ;;  %v203_v9 = vld [vmem:[#allocation3 + $0x8] sm:$0xff]  ;;  %v58_v14 = vld [vmem:[%s2088_s0 + $0x30] sm:$0xff]  ;;  %v207_v35 = vand.u32 127, %v206_v33  ;;  %s1768_s2 = smov 32  }
  0x29   :  { %1578 = vmatprep.subr.bf16.mxu1 %v1514_v3  ;;  %1515 = vmatprep.subr.bf16.mxu0 %v1514_v3  ;;  %v202_v8 = vld [vmem:[#allocation3] sm:$0xff]  ;;  %v57_v10 = vld [vmem:[%s2088_s0 + $0x28] sm:$0xff]  ;;  %v204_v15 = vld [vmem:[#allocation3 + $0x10] sm:$0xff] }
  0x2a   :  { %1580 = vmatpush3.bf16.msra.mxu1 %v1514_v3  ;;  %1517 = vmatpush3.bf16.msra.mxu0 %v1514_v3  ;;  %v1858_v11 = vpack.c.bf16 %v203_v9, %v202_v8  ;;  %v53_v12 = vld [vmem:[%s2088_s0 + $0x8] sm:$0xff]  ;;  %v205_v16 = vld [vmem:[#allocation3 + $0x18] sm:$0xff]  ;;  %v64_v24 = vld [vmem:[%s2091_s3] sm:$0xff]  ;;  %vm208_vm2 = vcmp.ge.s32.totalorder %v207_v35, 64  ;;  %vm209_vm3 = vcmp.lt.s32.totalorder %v207_v35, 96 }
  0x2b   :  { %1579 = vmatprep.subr.bf16.mxu1 %v1518_v6  ;;  %1519 = vmatprep.subr.bf16.mxu0 %v1518_v6  ;;  %v59_v17 = vld [vmem:[%s2088_s0 + $0x38] sm:$0xff]  ;;  %v1875_v18 = vpack.c.bf16 %v205_v16, %v204_v15  ;;  %vm1905_vm4 = vmand %vm208_vm2, %vm209_vm3  ;;  %v65_v49 = vld [vmem:[%s2091_s3 + $0x8] sm:$0xff] }
  0x2c   :  { %1394 = vmatprep.mubr.msk.f32.mxu0 %vm72_vm0, %v52_v7  ;;  %v54_v1 = vld [vmem:[%s2088_s0 + $0x10] sm:$0xff]  ;;  %v55_v2 = vld [vmem:[%s2088_s0 + $0x18] sm:$0xff] }
  0x2d   :  { %v66_v9 = vld [vmem:[%s2091_s3 + $0x10] sm:$0xff] }
  0x2e   :  { %1581 = vmatpush3.bf16.msra.mxu1 %v1518_v6  ;;  %1521 = vmatpush3.bf16.msra.mxu0 %v1518_v6 }
  0x2f   :  { %1522 = vmatprep.subr.bf16.mxu1 %v1764_v13  ;;  %1534 = vmatprep.subr.bf16.mxu0 %v1764_v13 }
  0x31   :  { %1401 = vmatmul.mubr.msk.f32.vlgmr.msra.gmra.mrb[0].mxu1 %vm72_vm0, %v57_v10  ;;  %1395 = vmatmul.mubr.msk.f32.vlgmr.msra.gmra.mrb[0].mxu0 %vm72_vm0, %v53_v12 }
  0x32   :  { %1524 = vmatpush3.bf16.msra.mxu1 %v1858_v11  ;;  %1403 = vmatprep.mubr.msk.f32.mxu1 %vm72_vm0, %v58_v14 }
  0x33   :  { %1525 = vmatprep.subr.bf16.mxu1 %v1764_v13  ;;  %1536 = vmatpush3.bf16.msra.mxu0 %v1858_v11 }
  0x34   :  { %1537 = vmatprep.subr.bf16.mxu0 %v1764_v13  ;;  %1397 = vmatprep.mubr.msk.f32.mxu0 %vm72_vm0, %v54_v1 }
  0x35   :  { %1404 = vmatmul.mubr.msk.f32.gmra.mrb[2].mxu1 %vm72_vm0, %v59_v17  ;;  %1398 = vmatmul.mubr.msk.f32.gmra.mrb[2].mxu0 %vm72_vm0, %v55_v2 }
  0x36   :  { %1527 = vmatpush3.bf16.msra.mxu1 %v1875_v18  ;;  %1414 = vmatprep.mubr.msk.f32.mxu1 %vm1765_vm1, %v1766_v19 }
  0x37   :  { %1528 = vmatprep.subr.bf16.mxu1 %v1764_v13  ;;  %1539 = vmatpush3.bf16.msra.mxu0 %v1875_v18 }
  0x38   :  { %1546 = vmatprep.subr.bf16.mxu0 %v1764_v13  ;;  %1436 = vmatprep.mubr.msk.f32.mxu0 %vm1765_vm1, %v1766_v19 }
  0x39   :  { %1415 = vmatmul.mubr.f32.vlgmr.msra.gmra.mrb[4].mxu1 %v1766_v19 }
  0x3a   :  { %1530 = vmatpush3.bf16.msra.mxu1 %v1858_v11  ;;  %1425 = vmatprep.mubr.msk.f32.mxu1 %vm1765_vm1, %v1766_v19 }
  0x3b   :  { %1531 = vmatprep.subr.bf16.mxu1 %v1764_v13 }
  0x3e   :  { %1533 = vmatpush3.bf16.msra.mxu1 %v1875_v18 }
  0x3f   :  { %1540 = vmatprep.subr.bf16.mxu1 %v1764_v13 }
 0x104   :  { %v1894_v20 = vpop.f32.mrb[0].mxu1  ;;  %v1396_v21 = vpop.f32.mrb[0].mxu0 }
 0x105   :  { %v1896_v22 = vpop.f32.mrb[1].mxu1  ;;  %v163_v23 = vpop.f32.mrb[1].mxu0  ;;  %v169_v50 = vadd.f32 %v1396_v21, %v65_v49 }
 0x106   :  { %v164_v27 = vadd.f32 %v163_v23, %v64_v24 }
 0x108   :  { %v1901_v25 = vpop.f32.mrb[2].mxu1  ;;  %v1399_v6 = vpop.f32.mrb[2].mxu0 }
 0x109   :  { %v1903_v26 = vpop.f32.mrb[3].mxu1  ;;  %v173_v7 = vpop.f32.mrb[3].mxu0 }
 0x10a   :  { %v174_v10 = vadd.f32 %v173_v7, %v66_v9 }
 0x10c   :  { %v280_v28 = vpop.f32.mrb[4].mxu1 }
 0x10d   :  { %v284_v29 = vadd.f32 %v280_v28, %v164_v27  ;;  %v1416_v30 = vpop.f32.mrb[5].mxu1 }
 0x10f   :  { %v1298_v31 = vmul.f32 -1.442695, %v284_v29 }
 0x111   :  { %1592 = vpow2.f32 %v1298_v31 }
 0x112   :  { %1594 = vtanh.f32 %v284_v29 }
 0x11b   :  { %v1593_v32 = vpop.eup %1592 }
 0x11c   :  { %v289_v34 = vadd.f32 1.0, %v1593_v32  ;;  %v1595_v37 = vpop.eup %1594 }
 0x11e   :  { %1596 = vrcp.f32 %v289_v34 }
 0x128   :  { %v1597_v38 = vpop.eup %1596 }
 0x129   :  { %v292_v39 = vsel %vm1905_vm4, %v1595_v37, %v1597_v38  ;;  %v67_v38 = vld [vmem:[%s2091_s3 + $0x18] sm:$0xff] }
 0x12a   :  { %295 = vrot.lane.b32.xlu0 %v292_v39, %s1767_s20  ;;  %v293_v42 = vmul.f32 0.0, %v292_v39 }
 0x19c   :  { %v296_v40 = vpop.permute.xlu0 %295 }
 0x19d   :  { %v298_v41 = vmul.f32 %v296_v40, %v292_v39 }
 0x19f   :  { %300 = vrot.lane.b32.xlu0 %v298_v41, %s1768_s2 }
 0x211   :  { %v301_v43 = vpop.permute.xlu0 %300 }
 0x212   :  { %v303_v44 = vadd.f32 %v301_v43, %v293_v42 }
 0x214   :  { %1598 = vtanh.f32 %v303_v44 }
 0x21e   :  { %v1599_v45 = vpop.eup %1598 }
 0x21f   :  { %306 = vrot.lane.b32.xlu1 %v1599_v45, %s1767_s20 }
 0x291   :  { %v307_v46 = vpop.permute.xlu1 %306 }
 0x292   :  { %v309_v47 = vmul.f32 %v307_v46, %v292_v39  ;;  %v179_v39 = vadd.f32 %v1399_v6, %v67_v38 }
 0x294   :  { %311 = vrot.lane.b32.xlu1 %v309_v47, %s1768_s2 }
 0x306   :  { %v312_v48 = vpop.permute.xlu1 %311 }
 0x307   :  { %314 = vst.msk [vmem:[#allocation2] sm:$0xff] %vm72_vm0, %v312_v48  ;;  %1426 = vmatmul.mubr.msk.f32.vlgmr.msra.gmra.mrb[6].mxu1 %vm72_vm0, %v312_v48 }
 0x308   :  { %1542 = vmatpush3.bf16.msra.mxu1 %v1858_v11  ;;  %1447 = vmatprep.mubr.msk.f32.mxu1 %vm1765_vm1, %v1766_v19 }
 0x309   :  { %1543 = vmatprep.subr.bf16.mxu1 %v1764_v13 }
 0x30c   :  { %1545 = vmatpush3.bf16.msra.mxu1 %v1875_v18 }
 0x30d   :  { %1552 = vmatprep.subr.bf16.mxu1 %v1764_v13 }
 0x3da   :  { %v383_v51 = vpop.f32.mrb[6].mxu1 }
 0x3db   :  { %v387_v52 = vadd.f32 %v383_v51, %v169_v50  ;;  %v1427_v53 = vpop.f32.mrb[7].mxu1 }
 0x3dd   :  { %v1300_v54 = vmul.f32 -1.442695, %v387_v52 }
 0x3df   :  { %1600 = vpow2.f32 %v1300_v54 }
 0x3e0   :  { %1602 = vtanh.f32 %v387_v52 }
 0x3e9   :  { %v1601_v55 = vpop.eup %1600 }
 0x3ea   :  { %v392_v56 = vadd.f32 1.0, %v1601_v55  ;;  %v1603_v57 = vpop.eup %1602 }
 0x3ec   :  { %1604 = vrcp.f32 %v392_v56 }
 0x3f6   :  { %v1605_v58 = vpop.eup %1604 }
 0x3f7   :  { %v395_v59 = vsel %vm1905_vm4, %v1603_v57, %v1605_v58  ;;  %v68_v58 = vld [vmem:[%s2091_s3 + $0x20] sm:$0xff] }
 0x3f8   :  { %398 = vrot.lane.b32.xlu0 %v395_v59, %s1767_s20  ;;  %v396_v62 = vmul.f32 %v395_v59, %v303_v44 }
 0x46a   :  { %v399_v60 = vpop.permute.xlu0 %398 }
 0x46b   :  { %v401_v61 = vmul.f32 %v399_v60, %v395_v59 }
 0x46d   :  { %403 = vrot.lane.b32.xlu1 %v401_v61, %s1768_s2 }
 0x4df   :  { %v404_v63 = vpop.permute.xlu1 %403 }
 0x4e0   :  { %v406_v0 = vadd.f32 %v404_v63, %v396_v62 }
 0x4e2   :  { %1606 = vtanh.f32 %v406_v0 }
 0x4ec   :  { %v1607_v3 = vpop.eup %1606 }
 0x4ed   :  { %409 = vrot.lane.b32.xlu0 %v1607_v3, %s1767_s20 }
 0x55f   :  { %v410_v4 = vpop.permute.xlu0 %409 }
 0x560   :  { %v412_v5 = vmul.f32 %v410_v4, %v395_v59  ;;  %v184_v59 = vadd.f32 %v1896_v22, %v68_v58 }
 0x562   :  { %414 = vrot.lane.b32.xlu1 %v412_v5, %s1768_s2 }
 0x5d4   :  { %v415_v8 = vpop.permute.xlu1 %414 }
 0x5d5   :  { %417 = vst.msk [vmem:[#allocation2 + $0x8] sm:$0xff] %vm72_vm0, %v415_v8  ;;  %1437 = vmatmul.mubr.msk.f32.vlgmr.msra.gmra.mrb[4].mxu0 %vm72_vm0, %v415_v8 }
 0x5d6   :  { %1548 = vmatpush3.bf16.msra.mxu0 %v1858_v11  ;;  %1458 = vmatprep.mubr.msk.f32.mxu0 %vm1765_vm1, %v1766_v19 }
 0x5d7   :  { %1549 = vmatprep.subr.bf16.mxu0 %v1764_v13 }
 0x5da   :  { %1551 = vmatpush3.bf16.msra.mxu0 %v1875_v18 }
 0x5db   :  { %1558 = vmatprep.subr.bf16.mxu0 %v1764_v13 }
 0x6a8   :  { %v486_v12 = vpop.f32.mrb[4].mxu0 }
 0x6a9   :  { %v490_v14 = vadd.f32 %v486_v12, %v174_v10  ;;  %v1438_v15 = vpop.f32.mrb[5].mxu0 }
 0x6aa   :  { %v69_v15 = vld [vmem:[%s2091_s3 + $0x28] sm:$0xff] }
 0x6ab   :  { %v1302_v16 = vmul.f32 -1.442695, %v490_v14 }
 0x6ad   :  { %1608 = vpow2.f32 %v1302_v16  ;;  %v189_v16 = vadd.f32 %v1894_v20, %v69_v15 }
 0x6ae   :  { %1610 = vtanh.f32 %v490_v14 }
 0x6b7   :  { %v1609_v17 = vpop.eup %1608 }
 0x6b8   :  { %v495_v21 = vadd.f32 1.0, %v1609_v17  ;;  %v1611_v23 = vpop.eup %1610 }
 0x6ba   :  { %1612 = vrcp.f32 %v495_v21 }
 0x6c4   :  { %v1613_v24 = vpop.eup %1612 }
 0x6c5   :  { %v498_v27 = vsel %vm1905_vm4, %v1611_v23, %v1613_v24 }
 0x6c6   :  { %501 = vrot.lane.b32.xlu0 %v498_v27, %s1767_s20  ;;  %v499_v30 = vmul.f32 %v498_v27, %v406_v0 }
 0x738   :  { %v502_v28 = vpop.permute.xlu0 %501 }
 0x739   :  { %v504_v29 = vmul.f32 %v502_v28, %v498_v27 }
 0x73b   :  { %506 = vrot.lane.b32.xlu1 %v504_v29, %s1768_s2 }
 0x7ad   :  { %v507_v31 = vpop.permute.xlu1 %506 }
 0x7ae   :  { %v509_v32 = vadd.f32 %v507_v31, %v499_v30 }
 0x7b0   :  { %1614 = vtanh.f32 %v509_v32 }
 0x7ba   :  { %v1615_v33 = vpop.eup %1614 }
 0x7bb   :  { %512 = vrot.lane.b32.xlu0 %v1615_v33, %s1767_s20  ;;  %v1045_v33 = vld [vmem:[#allocation6 + $0x8] sm:$0xff] }
 0x82d   :  { %v513_v34 = vpop.permute.xlu0 %512 }
 0x82e   :  { %v515_v35 = vmul.f32 %v513_v34, %v498_v27 }
 0x830   :  { %517 = vrot.lane.b32.xlu1 %v515_v35, %s1768_s2 }
 0x8a2   :  { %v518_v37 = vpop.permute.xlu1 %517 }
 0x8a3   :  { %520 = vst.msk [vmem:[#allocation2 + $0x10] sm:$0xff] %vm72_vm0, %v518_v37  ;;  %1448 = vmatmul.mubr.msk.f32.vlgmr.msra.gmra.mrb[8].mxu1 %vm72_vm0, %v518_v37 }
 0x8a4   :  { %1554 = vmatpush3.bf16.msra.mxu1 %v1858_v11  ;;  %1469 = vmatprep.mubr.msk.f32.mxu1 %vm1765_vm1, %v1766_v19 }
 0x8a5   :  { %1555 = vmatprep.subr.bf16.mxu1 %v1764_v13 }
 0x8a8   :  { %1557 = vmatpush3.bf16.msra.mxu1 %v1875_v18 }
 0x8a9   :  { %1564 = vmatprep.subr.bf16.mxu1 %v1764_v13 }
 0x976   :  { %v589_v40 = vpop.f32.mrb[8].mxu1 }
 0x977   :  { %v593_v41 = vadd.f32 %v589_v40, %v179_v39  ;;  %v1449_v42 = vpop.f32.mrb[9].mxu1  ;;  %v1046_v39 = vld [vmem:[#allocation6 + $0x10] sm:$0xff]  ;;  %v1047_v40 = vld [vmem:[#allocation6 + $0x18] sm:$0xff] }
 0x979   :  { %v1304_v43 = vmul.f32 -1.442695, %v593_v41 }
 0x97b   :  { %1616 = vpow2.f32 %v1304_v43  ;;  %v1036_v43 = vld [vmem:[#allocation2] sm:$0xff] }
 0x97c   :  { %1618 = vtanh.f32 %v593_v41  ;;  %v1574_v41 = vpack.c.bf16 %v1047_v40, %v1046_v39 }
 0x985   :  { %v1617_v44 = vpop.eup %1616 }
 0x986   :  { %v598_v45 = vadd.f32 1.0, %v1617_v44  ;;  %v1619_v46 = vpop.eup %1618  ;;  %v1037_v44 = vld [vmem:[#allocation2 + $0x8] sm:$0xff] }
 0x988   :  { %1620 = vrcp.f32 %v598_v45  ;;  %v1038_v45 = vld [vmem:[#allocation2 + $0x10] sm:$0xff] }
 0x992   :  { %v1621_v47 = vpop.eup %1620 }
 0x993   :  { %v601_v48 = vsel %vm1905_vm4, %v1619_v46, %v1621_v47 }
 0x994   :  { %604 = vrot.lane.b32.xlu0 %v601_v48, %s1767_s20  ;;  %v602_v51 = vmul.f32 %v601_v48, %v509_v32  ;;  %v1044_v32 = vld [vmem:[#allocation6] sm:$0xff] }
 0x995   :  { %v1570_v34 = vpack.c.bf16 %v1045_v33, %v1044_v32 }
 0xa06   :  { %v605_v49 = vpop.permute.xlu0 %604 }
 0xa07   :  { %v607_v50 = vmul.f32 %v605_v49, %v601_v48  ;;  %v70_v49 = vld [vmem:[%s2091_s3 + $0x30] sm:$0xff] }
 0xa09   :  { %609 = vrot.lane.b32.xlu1 %v607_v50, %s1768_s2  ;;  %v194_v50 = vadd.f32 %v1903_v26, %v70_v49 }
 0xa7b   :  { %v610_v52 = vpop.permute.xlu1 %609 }
 0xa7c   :  { %v612_v53 = vadd.f32 %v610_v52, %v602_v51 }
 0xa7e   :  { %1622 = vtanh.f32 %v612_v53 }
 0xa88   :  { %v1623_v54 = vpop.eup %1622 }
 0xa89   :  { %615 = vrot.lane.b32.xlu0 %v1623_v54, %s1767_s20 }
 0xafb   :  { %v616_v55 = vpop.permute.xlu0 %615 }
 0xafc   :  { %v618_v56 = vmul.f32 %v616_v55, %v601_v48 }
 0xafe   :  { %620 = vrot.lane.b32.xlu1 %v618_v56, %s1768_s2 }
 0xb70   :  { %v621_v57 = vpop.permute.xlu1 %620 }
 0xb71   :  { %623 = vst.msk [vmem:[#allocation2 + $0x18] sm:$0xff] %vm72_vm0, %v621_v57  ;;  %1459 = vmatmul.mubr.msk.f32.vlgmr.msra.gmra.mrb[6].mxu0 %vm72_vm0, %v621_v57 }
 0xb72   :  { %1560 = vmatpush3.bf16.msra.mxu0 %v1858_v11  ;;  %1480 = vmatprep.mubr.msk.f32.mxu0 %vm1765_vm1, %v1766_v19 }
 0xb73   :  { %1561 = vmatprep.subr.bf16.mxu0 %v1764_v13 }
 0xb76   :  { %1563 = vmatpush3.bf16.msra.mxu0 %v1875_v18 }
 0xb77   :  { %1571 = vmatprep.subr.bf16.mxu0 %v1570_v34 }
 0xb78   :  { %v1039_v46 = vld [vmem:[#allocation2 + $0x18] sm:$0xff] }
 0xc44   :  { %v692_v60 = vpop.f32.mrb[6].mxu0 }
 0xc45   :  { %v696_v61 = vadd.f32 %v692_v60, %v184_v59  ;;  %v1460_v62 = vpop.f32.mrb[7].mxu0 }
 0xc47   :  { %v1306_v63 = vmul.f32 -1.442695, %v696_v61 }
 0xc49   :  { %1624 = vpow2.f32 %v1306_v63 }
 0xc4a   :  { %1626 = vtanh.f32 %v696_v61 }
 0xc53   :  { %v1625_v0 = vpop.eup %1624 }
 0xc54   :  { %v701_v1 = vadd.f32 1.0, %v1625_v0  ;;  %v1627_v2 = vpop.eup %1626 }
 0xc56   :  { %1628 = vrcp.f32 %v701_v1 }
 0xc60   :  { %v1629_v3 = vpop.eup %1628 }
 0xc61   :  { %v704_v4 = vsel %vm1905_vm4, %v1627_v2, %v1629_v3 }
 0xc62   :  { %707 = vrot.lane.b32.xlu0 %v704_v4, %s1767_s20  ;;  %v705_v22 = vmul.f32 %v704_v4, %v612_v53 }
 0xcd4   :  { %v708_v5 = vpop.permute.xlu0 %707 }
 0xcd5   :  { %v710_v6 = vmul.f32 %v708_v5, %v704_v4 }
 0xcd7   :  { %712 = vrot.lane.b32.xlu1 %v710_v6, %s1768_s2 }
 0xd49   :  { %v713_v7 = vpop.permute.xlu1 %712 }
 0xd4a   :  { %v715_v8 = vadd.f32 %v713_v7, %v705_v22 }
 0xd4c   :  { %1630 = vtanh.f32 %v715_v8 }
 0xd56   :  { %v1631_v9 = vpop.eup %1630 }
 0xd57   :  { %718 = vrot.lane.b32.xlu0 %v1631_v9, %s1767_s20 }
 0xdc9   :  { %v719_v10 = vpop.permute.xlu0 %718 }
 0xdca   :  { %v721_v12 = vmul.f32 %v719_v10, %v704_v4  ;;  %v71_v10 = vld [vmem:[%s2091_s3 + $0x38] sm:$0xff] }
 0xdcc   :  { %723 = vrot.lane.b32.xlu1 %v721_v12, %s1768_s2  ;;  %v199_v12 = vadd.f32 %v1901_v25, %v71_v10 }
 0xe3e   :  { %v724_v14 = vpop.permute.xlu1 %723 }
 0xe3f   :  { %726 = vst.msk [vmem:[#allocation2 + $0x20] sm:$0xff] %vm72_vm0, %v724_v14  ;;  %1470 = vmatmul.mubr.msk.f32.vlgmr.msra.gmra.mrb[10].mxu1 %vm72_vm0, %v724_v14 }
 0xe40   :  { %1566 = vmatpush3.bf16.msra.mxu1 %v1858_v11  ;;  %1491 = vmatprep.mubr.msk.f32.mxu1 %vm1765_vm1, %v1766_v19 }
 0xe41   :  { %1567 = vmatprep.subr.bf16.mxu1 %v1764_v13 }
 0xe44   :  { %1569 = vmatpush3.bf16.msra.mxu1 %v1875_v18 }
 0xe46   :  { %v1040_v47 = vld [vmem:[#allocation2 + $0x20] sm:$0xff] }
 0xf12   :  { %v795_v17 = vpop.f32.mrb[10].mxu1 }
 0xf13   :  { %v799_v21 = vadd.f32 %v795_v17, %v189_v16  ;;  %v1471_v23 = vpop.f32.mrb[11].mxu1 }
 0xf15   :  { %v1308_v24 = vmul.f32 -1.442695, %v799_v21 }
 0xf17   :  { %1632 = vpow2.f32 %v1308_v24 }
 0xf18   :  { %1634 = vtanh.f32 %v799_v21 }
 0xf21   :  { %v1633_v27 = vpop.eup %1632 }
 0xf22   :  { %v804_v11 = vadd.f32 1.0, %v1633_v27  ;;  %v1635_v19 = vpop.eup %1634 }
 0xf24   :  { %1636 = vrcp.f32 %v804_v11 }
 0xf2e   :  { %v1637_v28 = vpop.eup %1636 }
 0xf2f   :  { %v807_v13 = vsel %vm1905_vm4, %v1635_v19, %v1637_v28 }
 0xf30   :  { %810 = vrot.lane.b32.xlu0 %v807_v13, %s1767_s20  ;;  %v808_v20 = vmul.f32 %v807_v13, %v715_v8 }
 0xfa2   :  { %v811_v18 = vpop.permute.xlu0 %810 }
 0xfa3   :  { %v813_v29 = vmul.f32 %v811_v18, %v807_v13 }
 0xfa5   :  { %815 = vrot.lane.b32.xlu1 %v813_v29, %s1768_s2 }
0x1017   :  { %v816_v30 = vpop.permute.xlu1 %815 }
0x1018   :  { %v818_v31 = vadd.f32 %v816_v30, %v808_v20  ;;  %v1313_v20 = vld [vmem:[%s2093_s5] ss:$0 sm:$0xff]  ;;  %s1769_s5 = smov [#allocation8]  }
0x1019   :  { %s1277_s15 = sshll.u32 %s1769_s5, 4  ;;  %s1278_s15 = int_to_ptr.vmem [resolvable:$true] %s1277_s15 }
0x101a   :  { %1638 = vtanh.f32 %v818_v31  ;;  %s1732_s16 = scalar_lea.vmem %s1278_s15, 1024  ;;  %p1737_p3 = scmp.lt.s32.totalorder %s1278_s15, %s1278_s15 }
0x101b   :  { %p1733_p2 = scmp.ne.s32.totalorder %s1278_s15, %s1732_s16  ;;  %p1738_p4 = scmp.lt.s32.totalorder %s1732_s16, %s1732_s16 }
0x101d   :  { %p1739_p5 = por %p1738_p4, %p1737_p3 }
0x101f   :  { %p1740_p6 = pnand %p1739_p5, %p1733_p2 }
0x1024   :  { %v1639_v35 = vpop.eup %1638 }
0x1025   :  { %821 = vrot.lane.b32.xlu0 %v1639_v35, %s1767_s20 }
0x1097   :  { %v822_v37 = vpop.permute.xlu0 %821 }
0x1098   :  { %v824_v38 = vmul.f32 %v822_v37, %v807_v13 }
0x109a   :  { %826 = vrot.lane.b32.xlu1 %v824_v38, %s1768_s2 }
0x110c   :  { %v827_v42 = vpop.permute.xlu1 %826 }
0x110d   :  { %829 = vst.msk [vmem:[#allocation2 + $0x28] sm:$0xff] %vm72_vm0, %v827_v42  ;;  %1481 = vmatmul.mubr.msk.f32.vlgmr.msra.gmra.mrb[8].mxu0 %vm72_vm0, %v827_v42 }
0x110e   :  { %1573 = vmatpush3.bf16.msra.mxu0 %v1570_v34  ;;  %1502 = vmatprep.mubr.msk.f32.mxu0 %vm72_vm0, %v1036_v43 }
0x110f   :  { %1575 = vmatprep.subr.bf16.mxu0 %v1574_v41 }
0x1112   :  { %1577 = vmatpush3.bf16.msra.mxu0 %v1574_v41 }
0x1114   :  { %v1041_v48 = vld [vmem:[#allocation2 + $0x28] sm:$0xff] }
0x1115   :  { %1503 = vmatmul.mubr.msk.f32.vlgmr.msra.gmra.mrb[10].mxu0 %vm72_vm0, %v1037_v44 }
0x1116   :  { %1505 = vmatprep.mubr.msk.f32.mxu0 %vm72_vm0, %v1038_v45 }
0x1119   :  { %1506 = vmatmul.mubr.msk.f32.gmra.mrb[12].mxu0 %vm72_vm0, %v1039_v46 }
0x111a   :  { %1508 = vmatprep.mubr.msk.f32.mxu0 %vm72_vm0, %v1040_v47 }
0x111d   :  { %1509 = vmatmul.mubr.msk.f32.gmra.mrb[14].mxu0 %vm72_vm0, %v1041_v48 }
0x11e0   :  { %v898_v51 = vpop.f32.mrb[8].mxu0 }
0x11e1   :  { %v902_v52 = vadd.f32 %v898_v51, %v194_v50  ;;  %v1482_v53 = vpop.f32.mrb[9].mxu0 }
0x11e3   :  { %v1310_v54 = vmul.f32 -1.442695, %v902_v52 }
0x11e5   :  { %1640 = vpow2.f32 %v1310_v54 }
0x11e6   :  { %1642 = vtanh.f32 %v902_v52 }
0x11e8   :  { %v2022_v55 = vpop.f32.mrb[10].mxu0 }
0x11e9   :  { %v1145_v56 = vpop.f32.mrb[11].mxu0  ;;  %v1151_v35 = vadd.f32 %v2022_v55, %v1313_v20 }
0x11ea   :  { %v1146_v30 = vadd.f32 %v1313_v20, %v1145_v56 }
0x11ec   :  { %v1507_v57 = vpop.f32.mrb[12].mxu0 }
0x11ed   :  { %v1155_v58 = vpop.f32.mrb[13].mxu0 }
0x11ee   :  { %v1156_v36 = vadd.f32 %v1313_v20, %v1155_v58 }
0x11ef   :  { %v1641_v59 = vpop.eup %1640 }
0x11f0   :  { %v907_v60 = vadd.f32 1.0, %v1641_v59  ;;  %v1510_v61 = vpop.f32.mrb[14].mxu0  ;;  %v1643_v63 = vpop.eup %1642 }
0x11f1   :  { %v1165_v62 = vpop.f32.mrb[15].mxu0  ;;  %v1171_v32 = vadd.f32 %v1510_v61, %v1313_v20 }
0x11f2   :  { %1644 = vrcp.f32 %v907_v60  ;;  %v1166_v37 = vadd.f32 %v1313_v20, %v1165_v62 }
0x11fc   :  { %v1645_v0 = vpop.eup %1644 }
0x11fd   :  { %v910_v26 = vsel %vm1905_vm4, %v1643_v63, %v1645_v0 }
0x11fe   :  { %913 = vrot.lane.b32.xlu0 %v910_v26, %s1767_s20  ;;  %v911_v3 = vmul.f32 %v910_v26, %v818_v31  ;;  %v1161_v31 = vadd.f32 %v1507_v57, %v1313_v20 }
0x1270   :  { %v914_v1 = vpop.permute.xlu0 %913 }
0x1271   :  { %v916_v2 = vmul.f32 %v914_v1, %v910_v26 }
0x1273   :  { %918 = vrot.lane.b32.xlu1 %v916_v2, %s1768_s2 }
0x12e5   :  { %v919_v4 = vpop.permute.xlu1 %918 }
0x12e6   :  { %v921_v5 = vadd.f32 %v919_v4, %v911_v3 }
0x12e8   :  { %1646 = vtanh.f32 %v921_v5 }
0x12f2   :  { %v1647_v6 = vpop.eup %1646 }
0x12f3   :  { %924 = vrot.lane.b32.xlu0 %v1647_v6, %s1767_s20 }
0x1365   :  { %v925_v22 = vpop.permute.xlu0 %924 }
0x1366   :  { %v927_v7 = vmul.f32 %v925_v22, %v910_v26 }
0x1368   :  { %929 = vrot.lane.b32.xlu1 %v927_v7, %s1768_s2 }
0x13da   :  { %v930_v8 = vpop.permute.xlu1 %929 }
0x13db   :  { %932 = vst.msk [vmem:[#allocation2 + $0x30] sm:$0xff] %vm72_vm0, %v930_v8  ;;  %1492 = vmatmul.mubr.msk.f32.vlgmr.msra.gmra.mrb[12].mxu1 %vm72_vm0, %v930_v8 }
0x13e2   :  { %v1042_v9 = vld [vmem:[#allocation2 + $0x30] sm:$0xff] }
0x13e3   :  { %1511 = vmatprep.mubr.msk.f32.mxu0 %vm72_vm0, %v1042_v9 }
0x14ae   :  { %v1001_v14 = vpop.f32.mrb[12].mxu1 }
0x14af   :  { %v1005_v15 = vadd.f32 %v1001_v14, %v199_v12  ;;  %v1493_v16 = vpop.f32.mrb[13].mxu1 }
0x14b1   :  { %v1312_v17 = vmul.f32 -1.442695, %v1005_v15 }
0x14b3   :  { %1648 = vpow2.f32 %v1312_v17 }
0x14b4   :  { %1650 = vtanh.f32 %v1005_v15 }
0x14bd   :  { %v1649_v21 = vpop.eup %1648 }
0x14be   :  { %v1010_v23 = vadd.f32 1.0, %v1649_v21  ;;  %v1651_v24 = vpop.eup %1650 }
0x14c0   :  { %1652 = vrcp.f32 %v1010_v23 }
0x14ca   :  { %v1653_v27 = vpop.eup %1652 }
0x14cb   :  { %v1013_v11 = vsel %vm1905_vm4, %v1651_v24, %v1653_v27 }
0x14cc   :  { %1016 = vrot.lane.b32.xlu0 %v1013_v11, %s1767_s20  ;;  %v1014_v25 = vmul.f32 %v1013_v11, %v921_v5 }
0x153e   :  { %v1017_v19 = vpop.permute.xlu0 %1016 }
0x153f   :  { %v1019_v28 = vmul.f32 %v1017_v19, %v1013_v11 }
0x1541   :  { %1021 = vrot.lane.b32.xlu1 %v1019_v28, %s1768_s2 }
0x15b3   :  { %v1022_v13 = vpop.permute.xlu1 %1021 }
0x15b4   :  { %v1024_v18 = vadd.f32 %v1022_v13, %v1014_v25 }
0x15b6   :  { %1654 = vtanh.f32 %v1024_v18 }
0x15c0   :  { %v1655_v29 = vpop.eup %1654 }
0x15c1   :  { %1027 = vrot.lane.b32.xlu0 %v1655_v29, %s1767_s20 }
0x15e0   :  { %1184 = vmax.xlane.f32.xlu0 %v1146_v30 }
0x15e4   :  { %1188 = vmax.xlane.f32.xlu0 %v1156_v36 }
0x15e8   :  { %1190 = vmax.xlane.f32.xlu0 %v1161_v31 }
0x15ec   :  { %1194 = vmax.xlane.f32.xlu0 %v1171_v32 }
0x1633   :  { %v1028_v33 = vpop.permute.xlu0 %1027 }
0x1634   :  { %v1030_v34 = vmul.f32 %v1028_v33, %v1013_v11 }
0x1636   :  { %1032 = vrot.lane.b32.xlu1 %v1030_v34, %s1768_s2 }
0x165a   :  { %1186 = vmax.xlane.f32.xlu1 %v1151_v35 }
0x165e   :  { %1192 = vmax.xlane.f32.xlu1 %v1166_v37 }
0x166d   :  { %v1185_v40 = vpop.xlane.xlu0 %1184 }
0x166e   :  { %v2051_v45 = vsub.f32 %v1146_v30, %v1185_v40 }
0x1670   :  { %v1208_v48 = vmul.f32 1.442695, %v2051_v45 }
0x1671   :  { %v1189_v41 = vpop.xlane.xlu0 %1188 }
0x1672   :  { %v2057_v49 = vsub.f32 %v1156_v36, %v1189_v41 }
0x1674   :  { %v1212_v54 = vmul.f32 1.442695, %v2057_v49 }
0x1675   :  { %v1191_v43 = vpop.xlane.xlu0 %1190 }
0x1676   :  { %v2053_v46 = vsub.f32 %v1161_v31, %v1191_v43 }
0x1678   :  { %v1214_v52 = vmul.f32 1.442695, %v2053_v46 }
0x1679   :  { %v1195_v50 = vpop.xlane.xlu0 %1194 }
0x167a   :  { %v2060_v53 = vsub.f32 %v1171_v32, %v1195_v50 }
0x167c   :  { %v1218_v56 = vmul.f32 1.442695, %v2060_v53 }
0x16a8   :  { %v1033_v38 = vpop.permute.xlu1 %1032 }
0x16a9   :  { %1035 = vst.msk [vmem:[#allocation2 + $0x38] sm:$0xff] %vm72_vm0, %v1033_v38 }
0x16b0   :  { %v1043_v39 = vld [vmem:[#allocation2 + $0x38] sm:$0xff] }
0x16b1   :  { %1512 = vmatmul.mubr.msk.f32.gmra.mrb[16].mxu0 %vm72_vm0, %v1043_v39 }
0x16e7   :  { %v1187_v42 = vpop.xlane.xlu1 %1186 }
0x16e8   :  { %v2049_v44 = vsub.f32 %v1151_v35, %v1187_v42 }
0x16ea   :  { %v1210_v47 = vmul.f32 1.442695, %v2049_v44 }
0x16eb   :  { %v1193_v51 = vpop.xlane.xlu1 %1192 }
0x16ec   :  { %1656 = vpow2.f32 %v1210_v47  ;;  %v2063_v55 = vsub.f32 %v1166_v37, %v1193_v51 }
0x16ed   :  { %1658 = vpow2.f32 %v1208_v48 }
0x16ee   :  { %1660 = vpow2.f32 %v1214_v52  ;;  %v1216_v58 = vmul.f32 1.442695, %v2063_v55 }
0x16ef   :  { %1662 = vpow2.f32 %v1212_v54 }
0x16f0   :  { %1664 = vpow2.f32 %v1218_v56 }
0x16f1   :  { %1666 = vpow2.f32 %v1216_v58 }
0x16f6   :  { %v1657_v62 = vpop.eup %1656 }
0x16f7   :  { %v1659_v63 = vpop.eup %1658 }
0x16f8   :  { %v1661_v0 = vpop.eup %1660 }
0x16f9   :  { %v1663_v26 = vpop.eup %1662 }
0x16fa   :  { %v1665_v1 = vpop.eup %1664 }
0x16fb   :  { %v1667_v2 = vpop.eup %1666 }
0x1784   :  { %v1513_v57 = vpop.f32.mrb[16].mxu0 }
0x1785   :  { %v1181_v59 = vadd.f32 %v1513_v57, %v1313_v20  ;;  %v1175_v60 = vpop.f32.mrb[17].mxu0 }
0x1786   :  { %v1176_v61 = vadd.f32 %v1313_v20, %v1175_v60 }
0x1787   :  { %1198 = vmax.xlane.f32.xlu0 %v1181_v59 }
0x1788   :  { %1196 = vmax.xlane.f32.xlu1 %v1176_v61 }
0x178b   :  { %1226 = vadd.xlane.f32.xlu0 %v1657_v62 }
0x178c   :  { %1224 = vadd.xlane.f32.xlu1 %v1659_v63 }
0x178f   :  { %1230 = vadd.xlane.f32.xlu0 %v1661_v0 }
0x1790   :  { %1228 = vadd.xlane.f32.xlu1 %v1663_v26 }
0x1793   :  { %1234 = vadd.xlane.f32.xlu0 %v1665_v1 }
0x1794   :  { %1232 = vadd.xlane.f32.xlu1 %v1667_v2 }
0x1814   :  { %v1199_v3 = vpop.xlane.xlu0 %1198 }
0x1815   :  { %v1207_v4 = vsub.f32 %v1181_v59, %v1199_v3  ;;  %v1197_v5 = vpop.xlane.xlu1 %1196 }
0x1816   :  { %v1206_v6 = vsub.f32 %v1176_v61, %v1197_v5 }
0x1817   :  { %v1222_v22 = vmul.f32 1.442695, %v1207_v4 }
0x1818   :  { %v1220_v7 = vmul.f32 1.442695, %v1206_v6  ;;  %v1227_v8 = vpop.xlane.xlu0 %1226 }
0x1819   :  { %1668 = vpow2.f32 %v1222_v22  ;;  %v1225_v9 = vpop.xlane.xlu1 %1224 }
0x181a   :  { %1670 = vpow2.f32 %v1220_v7 }
0x181b   :  { %1672 = vlog2.f32 %v1227_v8 }
0x181c   :  { %1674 = vlog2.f32 %v1225_v9  ;;  %v1231_v10 = vpop.xlane.xlu0 %1230 }
0x181d   :  { %1676 = vlog2.f32 %v1231_v10  ;;  %v1229_v12 = vpop.xlane.xlu1 %1228 }
0x181e   :  { %1678 = vlog2.f32 %v1229_v12 }
0x1820   :  { %v1235_v14 = vpop.xlane.xlu0 %1234 }
0x1821   :  { %1680 = vlog2.f32 %v1235_v14  ;;  %v1233_v15 = vpop.xlane.xlu1 %1232 }
0x1822   :  { %1682 = vlog2.f32 %v1233_v15 }
0x1823   :  { %v1669_v16 = vpop.eup %1668 }
0x1824   :  { %v1671_v17 = vpop.eup %1670  ;;  %1238 = vadd.xlane.f32.xlu0 %v1669_v16 }
0x1825   :  { %v1673_v21 = vpop.eup %1672  ;;  %1236 = vadd.xlane.f32.xlu1 %v1671_v17 }
0x1826   :  { %v1675_v23 = vpop.eup %1674  ;;  %v1243_v24 = vmul.f32 0.6931472, %v1673_v21 }
0x1827   :  { %v1677_v27 = vpop.eup %1676  ;;  %v1241_v11 = vmul.f32 0.6931472, %v1675_v23 }
0x1828   :  { %v1679_v19 = vpop.eup %1678  ;;  %v1257_v28 = vsub.f32 %v2049_v44, %v1243_v24  ;;  %v1247_v25 = vmul.f32 0.6931472, %v1677_v27 }
0x1829   :  { %v1256_v13 = vsub.f32 %v2051_v45, %v1241_v11  ;;  %v1245_v18 = vmul.f32 0.6931472, %v1679_v19 }
0x182a   :  { %1265 = vst [vmem:[#allocation8 + $0x8] sm:$0xff] %v1257_v28  ;;  %v1259_v29 = vsub.f32 %v2053_v46, %v1247_v25 }
0x182b   :  { %v1681_v20 = vpop.eup %1680  ;;  %1264 = vst [vmem:[#allocation8] sm:$0xff] %v1256_v13  ;;  %v1258_v30 = vsub.f32 %v2057_v49, %v1245_v18 }
0x182c   :  { %v1683_v36 = vpop.eup %1682  ;;  %1267 = vst [vmem:[#allocation8 + $0x18] sm:$0xff] %v1259_v29  ;;  %v1251_v31 = vmul.f32 0.6931472, %v1681_v20 }
0x182d   :  { %1266 = vst [vmem:[#allocation8 + $0x10] sm:$0xff] %v1258_v30  ;;  %v1249_v32 = vmul.f32 0.6931472, %v1683_v36 }
0x182e   :  { %v1261_v33 = vsub.f32 %v2060_v53, %v1251_v31 }
0x182f   :  { %v1260_v34 = vsub.f32 %v2063_v55, %v1249_v32 }
0x1830   :  { %1269 = vst [vmem:[#allocation8 + $0x28] sm:$0xff] %v1261_v33 }
0x1831   :  { %1268 = vst [vmem:[#allocation8 + $0x20] sm:$0xff] %v1260_v34 }
0x18b1   :  { %v1239_v35 = vpop.xlane.xlu0 %1238 }
0x18b2   :  { %1684 = vlog2.f32 %v1239_v35  ;;  %v1237_v37 = vpop.xlane.xlu1 %1236 }
0x18b3   :  { %1686 = vlog2.f32 %v1237_v37 }
0x18bc   :  { %v1685_v38 = vpop.eup %1684 }
0x18bd   :  { %v1687_v39 = vpop.eup %1686  ;;  %v1255_v40 = vmul.f32 0.6931472, %v1685_v38 }
0x18be   :  { %v1253_v41 = vmul.f32 0.6931472, %v1687_v39 }
0x18bf   :  { %v1263_v42 = vsub.f32 %v1207_v4, %v1255_v40 }
0x18c0   :  { %v1262_v43 = vsub.f32 %v1206_v6, %v1253_v41 }
0x18c1   :  { %1271 = vst [vmem:[#allocation8 + $0x38] sm:$0xff] %v1263_v42 }
0x18c2   :  { %1270 = vst [vmem:[#allocation8 + $0x30] sm:$0xff] %v1262_v43 }
0x18c3   :  { %1743 = shalt.err (!%p1740_p6)
}
0x18c4   :  { %s1744_s19 = scalar_lea.hbm %s2094_s6, 1024 }
0x18c5   :  { %p1745_p7 = scmp.ne.s32.totalorder %s2094_s6, %s1744_s19  ;;  %p1748_p8 = scmp.lt.u32.totalorder %s1744_s19, %s2094_s6 }
0x18c7   :  { %p1750_p9 = pnand %p1748_p8, %p1745_p7 }
0x18c9   :  { %1753 = shalt.err (!%p1750_p9)
}
0x18ca   :  { %1283 = dma.vmem_to_hbm [thread:$0]  %s1278_s15, 1024, %s2094_s6, [#allocation5], %s1761_s7, %s1761_s7, %s1762_s8  }
0x18cb   :  { %1758 = dma.done.wait [#allocation5], 1024  }
0x18cc   :  { %1759 = vsyncadd [#allocation5], 4294966272 }
0x18cd   :  { %1287 = vsyncpa [#allocation4], 1 }
0x18ce   :  { %1288 = vsyncpa [#allocation7], 1 }
0x18cf   :  { %1289 = vsyncpa [#allocation5], 1 }

</bundles_post_ra>
